<compile_context>
chip_gen: v5e
topology: v5e:2x2
jax: 0.10.0
libtpu: 0.0.40
codegen_flags: <defaults>
</compile_context>

<pallas_src>
import functools

import jax
import jax.numpy as jnp
from jax.experimental import pallas as pl
from jax.experimental.pallas import tpu as pltpu

EPS = 1e-6


def admmnet_kernel(yT_ref, w_ref, b_ref, theta_ref, eta_ref, dec_ref,
                   abundT_ref, outT_ref, *, nblocks, p, tied):
    """One batch-tile of the ADMMNet forward pass, transposed (lane-dense) layout.

    yT_ref:     (L, TB)          input tile, batch on lanes
    w_ref:      (nb_w*p, L)      stacked W weights (nb_w = 1 if tied else nblocks)
    b_ref:      (nb_w, p, p)     B weights
    theta_ref:  (nb_w, p, 1)     theta column vectors (broadcast over batch lanes)
    eta_ref:    (nb_w,)          eta scalars in SMEM
    dec_ref:    (L, p)           decoder weight A_init
    abundT_ref: (p, TB)          output abundances (transposed)
    outT_ref:   (L, TB)          reconstruction (transposed)
    """
    yT = yT_ref[...]                                   # (L, TB)
    tb = yT.shape[1]

    # Hoisted, loop-invariant matmul: every block's W @ y^T in one MXU push.
    wy_all = jnp.dot(w_ref[...], yT,
                     preferred_element_type=jnp.float32)  # (nb_w*p, TB)

    z = jnp.zeros((p, tb), jnp.float32)
    d = jnp.zeros((p, tb), jnp.float32)

    # nblocks is a static trace-time constant -> unrolled loop.
    for ii in range(nblocks):
        wi = 0 if tied else ii
        wy = wy_all[wi * p:(wi + 1) * p, :]            # (p, TB), static slice
        # X_block: x^T = W y^T + B (z + d)^T
        x = wy + jnp.dot(b_ref[wi], z + d,
                         preferred_element_type=jnp.float32)
        # Z_block: z = relu(x - d - theta)   (theta broadcasts over lanes)
        z = jnp.maximum(x - d - theta_ref[wi], 0.0)
        # D_block: d = d - eta * (x - z)     (eta is an SMEM scalar)
        d = d - eta_ref[wi] * (x - z)

    # abund = z / (sum_p z + EPS)
    #   sublane reduce (XLU) + EUP approx reciprocal + one Newton step (VALU)
    #   -> near-exact f32 normalization without a full-latency divide.
    zsum = jnp.sum(z, axis=0, keepdims=True) + EPS     # (1, TB)
    r0 = pl.reciprocal(zsum, approx=True)
    r = r0 * (2.0 - zsum * r0)                         # Newton refinement
    abundT = z * r
    abundT_ref[...] = abundT.astype(abundT_ref.dtype)
    # decoder: out^T = A_init @ abund^T
    outT_ref[...] = jnp.dot(dec_ref[...], abundT,
                            preferred_element_type=jnp.float32
                            ).astype(outT_ref.dtype)


@functools.partial(jax.jit, static_argnames=("nblocks", "tied", "tile_b"))
def admmnet_forward(y, w_all, b_all, theta_all, eta_all, dec, *,
                    nblocks, tied, tile_b=256):
    """y: (bs, L). Returns (abund (bs, p), output (bs, L)), matching the module."""
    bs, L = y.shape
    nb_w, p, _ = b_all.shape

    # Batch on the lane axis; pad batch up to a multiple of the tile.
    bs_pad = ((bs + tile_b - 1) // tile_b) * tile_b
    yT = y.T                                           # (L, bs)
    if bs_pad != bs:
        yT = jnp.pad(yT, ((0, 0), (0, bs_pad - bs)))

    grid = (bs_pad // tile_b,)
    kernel = functools.partial(admmnet_kernel, nblocks=nblocks, p=p, tied=tied)

    abundT, outT = pl.pallas_call(
        kernel,
        grid=grid,
        in_specs=[
            pl.BlockSpec((L, tile_b), lambda i: (0, i)),           # y^T tile
            pl.BlockSpec((nb_w * p, L), lambda i: (0, 0)),         # W stack
            pl.BlockSpec((nb_w, p, p), lambda i: (0, 0, 0)),       # B stack
            pl.BlockSpec((nb_w, p, 1), lambda i: (0, 0, 0)),       # theta stack
            pl.BlockSpec(memory_space=pltpu.MemorySpace.SMEM),     # eta scalars
            pl.BlockSpec((L, p), lambda i: (0, 0)),                # decoder A
        ],
        out_specs=[
            pl.BlockSpec((p, tile_b), lambda i: (0, i)),           # abund^T
            pl.BlockSpec((L, tile_b), lambda i: (0, i)),           # out^T
        ],
        out_shape=(
            jax.ShapeDtypeStruct((p, bs_pad), jnp.float32),
            jax.ShapeDtypeStruct((L, bs_pad), jnp.float32),
        ),
        compiler_params=pltpu.CompilerParams(
            dimension_semantics=("parallel",)),
    )(yT, w_all, b_all, theta_all, eta_all, dec)

    return abundT[:, :bs].T, outT[:, :bs].T


def make_params(key, L, p, nblocks, mu, lambd, eta_init=1.0, tied=True):
    """Synthetic init mirroring ADMMNet.init_architecture (A_init plays VCA's role)."""
    # TODO(synk): VCA endmember extraction (numpy SVD/pinv loop) is host-side
    # preprocessing in `solve`, not part of the forward pass; a random positive
    # A_init stands in for its output here.
    k_a, k_pert = jax.random.split(key)
    A_init = jax.random.uniform(k_a, (L, p), jnp.float32, minval=0.1, maxval=1.0)

    M = A_init.T @ A_init + mu * jnp.eye(p, dtype=jnp.float32)          # (p, p)
    W = jnp.linalg.solve(M, A_init.T)                                   # (p, L)
    B = jnp.linalg.solve(M, mu * jnp.eye(p, dtype=jnp.float32))         # (p, p)
    theta = (lambd / mu) * jnp.ones((p,), jnp.float32)

    if tied:
        # Single shared block instance -> pass weights once (no stacking).
        w_all = W                                        # (p, L)
        b_all = B[None]                                  # (1, p, p)
        theta_all = theta[None, :, None]                 # (1, p, 1)
        eta_all = eta_init * jnp.ones((1,), jnp.float32)
    else:
        # Untied: perturb per block so the per-block indexing is exercised.
        scales = (1.0 + 0.05 * jax.random.normal(k_pert, (nblocks, 1, 1))
                  ).astype(jnp.float32)
        w_all = jnp.reshape(W[None] * scales, (nblocks * p, L))
        b_all = B[None] * scales
        theta_all = jnp.broadcast_to(theta[None, :, None], (nblocks, p, 1))
        theta_all = jnp.asarray(theta_all, jnp.float32)
        eta_all = (eta_init * jnp.linspace(0.8, 1.2, nblocks)).astype(jnp.float32)
    return w_all, b_all, theta_all, eta_all, A_init


def reference_forward(y, w_all, b_all, theta_all, eta_all, dec, nblocks, tied):
    """Pure-JAX reference of the same math, in the original (bs, feature) layout."""
    bs, _ = y.shape
    p = b_all.shape[-1]
    z = jnp.zeros((bs, p), jnp.float32)
    d = jnp.zeros((bs, p), jnp.float32)
    for ii in range(nblocks):
        wi = 0 if tied else ii
        W = w_all[wi * p:(wi + 1) * p]                   # (p, L)
        B = b_all[wi]                                    # (p, p)
        theta = theta_all[wi, :, 0]                      # (p,)
        eta = eta_all[wi]
        x = y @ W.T + (z + d) @ B.T
        z = jnp.maximum(x - d - theta, 0.0)
        d = d - eta * (x - z)
    abund = z / (jnp.sum(z, axis=1, keepdims=True) + EPS)
    return abund, abund @ dec.T


if __name__ == "__main__":
    # Small but lane-dense shapes: L bands, p endmembers, bs pixels.
    bs, L, p, nblocks = 512, 32, 8, 3
    mu, lambd = 0.5, 0.1

    key = jax.random.PRNGKey(0)
    k_y, k_param = jax.random.split(key)
    y = jax.random.uniform(k_y, (bs, L), jnp.float32, minval=0.0, maxval=1.0)

    for tied in (True, False):
        w_all, b_all, theta_all, eta_all, A_init = make_params(
            k_param, L, p, nblocks, mu, lambd, tied=tied)

        abund, out = admmnet_forward(y, w_all, b_all, theta_all, eta_all,
                                     A_init, nblocks=nblocks, tied=tied,
                                     tile_b=256)
        jax.block_until_ready((abund, out))

        abund_ref, out_ref = reference_forward(y, w_all, b_all, theta_all,
                                               eta_all, A_init, nblocks, tied)
        # Newton-refined EUP reciprocal -> near-f32 normalization accuracy.
        assert float(jnp.max(jnp.abs(abund - abund_ref))) < 1e-3
        assert float(jnp.max(jnp.abs(out - out_ref))) < 1e-3

    print("KERNEL_OK")
</pallas_src>

<mosaic_0001>
module attributes {stable_mosaic.version = 11 : i64} {
  func.func @admmnet_kernel(%arg0: i32, %arg1: memref<32x256xf32, #tpu.memory_space<vmem>>, %arg2: memref<8x32xf32, #tpu.memory_space<vmem>>, %arg3: memref<1x8x8xf32, #tpu.memory_space<vmem>>, %arg4: memref<1x8x1xf32, #tpu.memory_space<vmem>>, %arg5: memref<1xf32, #tpu.memory_space<smem>>, %arg6: memref<32x8xf32, #tpu.memory_space<vmem>>, %arg7: memref<8x256xf32, #tpu.memory_space<vmem>>, %arg8: memref<32x256xf32, #tpu.memory_space<vmem>>) attributes {dimension_semantics = [#tpu.dimension_semantics<parallel>], iteration_bounds = array<i64: 2>, scalar_prefetch = 0 : i64, scratch_operands = 0 : i64, tpu.core_type = #tpu.core_type<tc>, window_params = [{transform_indices = @transform_0, window_bounds = array<i64: 32, 256>}, {pipeline_mode = #tpu.pipeline_mode<synchronous>, transform_indices = @transform_1, window_bounds = array<i64: 8, 32>}, {pipeline_mode = #tpu.pipeline_mode<synchronous>, transform_indices = @transform_2, window_bounds = array<i64: 1, 8, 8>}, {pipeline_mode = #tpu.pipeline_mode<synchronous>, transform_indices = @transform_3, window_bounds = array<i64: 1, 8, 1>}, {transform_indices = @transform_4, window_bounds = array<i64: 1>}, {pipeline_mode = #tpu.pipeline_mode<synchronous>, transform_indices = @transform_5, window_bounds = array<i64: 32, 8>}, {transform_indices = @transform_6, window_bounds = array<i64: 8, 256>}, {transform_indices = @transform_7, window_bounds = array<i64: 32, 256>}]} {
    %c0 = arith.constant 0 : index
    %c0_0 = arith.constant 0 : index
    %0 = vector.load %arg1[%c0, %c0_0] : memref<32x256xf32, #tpu.memory_space<vmem>>, vector<32x256xf32>
    %c0_1 = arith.constant 0 : index
    %c0_2 = arith.constant 0 : index
    %1 = vector.load %arg2[%c0_1, %c0_2] : memref<8x32xf32, #tpu.memory_space<vmem>>, vector<8x32xf32>
    %cst = arith.constant dense<0.000000e+00> : vector<8x256xf32>
    %2 = tpu.matmul %1, %0, %cst {dimension_numbers = #tpu.dot_dimension_numbers<[1], [0], [0], [1], [0, 0, 1, 1], [], []>} : vector<8x32xf32>, vector<32x256xf32>, vector<8x256xf32> -> vector<8x256xf32>
    %cst_3 = arith.constant 0.000000e+00 : f32
    %3 = vector.broadcast %cst_3 : f32 to vector<8x256xf32>
    %cst_4 = arith.constant 0.000000e+00 : f32
    %4 = vector.broadcast %cst_4 : f32 to vector<8x256xf32>
    %c0_5 = arith.constant 0 : index
    %c0_6 = arith.constant 0 : index
    %c0_7 = arith.constant 0 : index
    %5 = vector.load %arg3[%c0_5, %c0_6, %c0_7] : memref<1x8x8xf32, #tpu.memory_space<vmem>>, vector<1x8x8xf32>
    %6 = vector.shape_cast %5 : vector<1x8x8xf32> to vector<8x8xf32>
    %7 = arith.addf %3, %4 : vector<8x256xf32>
    %cst_8 = arith.constant dense<0.000000e+00> : vector<8x256xf32>
    %8 = tpu.matmul %6, %7, %cst_8 {dimension_numbers = #tpu.dot_dimension_numbers<[1], [0], [0], [1], [0, 0, 1, 1], [], []>} : vector<8x8xf32>, vector<8x256xf32>, vector<8x256xf32> -> vector<8x256xf32>
    %9 = arith.addf %2, %8 : vector<8x256xf32>
    %10 = arith.subf %9, %4 : vector<8x256xf32>
    %c0_9 = arith.constant 0 : index
    %c0_10 = arith.constant 0 : index
    %c0_11 = arith.constant 0 : index
    %11 = vector.load %arg4[%c0_9, %c0_10, %c0_11] : memref<1x8x1xf32, #tpu.memory_space<vmem>>, vector<1x8x1xf32>
    %12 = vector.shape_cast %11 : vector<1x8x1xf32> to vector<8x1xf32>
    %13 = vector.broadcast %12 : vector<8x1xf32> to vector<8x256xf32>
    %14 = arith.subf %10, %13 : vector<8x256xf32>
    %cst_12 = arith.constant 0.000000e+00 : f32
    %15 = vector.broadcast %cst_12 : f32 to vector<8x256xf32>
    %16 = arith.maximumf %14, %15 : vector<8x256xf32>
    %c0_13 = arith.constant 0 : index
    %17 = memref.load %arg5[%c0_13] : memref<1xf32, #tpu.memory_space<smem>>
    %18 = arith.subf %9, %16 : vector<8x256xf32>
    %19 = vector.broadcast %17 : f32 to vector<8x256xf32>
    %20 = arith.mulf %19, %18 : vector<8x256xf32>
    %21 = arith.subf %4, %20 : vector<8x256xf32>
    %c0_14 = arith.constant 0 : index
    %c0_15 = arith.constant 0 : index
    %c0_16 = arith.constant 0 : index
    %22 = vector.load %arg3[%c0_14, %c0_15, %c0_16] : memref<1x8x8xf32, #tpu.memory_space<vmem>>, vector<1x8x8xf32>
    %23 = vector.shape_cast %22 : vector<1x8x8xf32> to vector<8x8xf32>
    %24 = arith.addf %16, %21 : vector<8x256xf32>
    %cst_17 = arith.constant dense<0.000000e+00> : vector<8x256xf32>
    %25 = tpu.matmul %23, %24, %cst_17 {dimension_numbers = #tpu.dot_dimension_numbers<[1], [0], [0], [1], [0, 0, 1, 1], [], []>} : vector<8x8xf32>, vector<8x256xf32>, vector<8x256xf32> -> vector<8x256xf32>
    %26 = arith.addf %2, %25 : vector<8x256xf32>
    %27 = arith.subf %26, %21 : vector<8x256xf32>
    %c0_18 = arith.constant 0 : index
    %c0_19 = arith.constant 0 : index
    %c0_20 = arith.constant 0 : index
    %28 = vector.load %arg4[%c0_18, %c0_19, %c0_20] : memref<1x8x1xf32, #tpu.memory_space<vmem>>, vector<1x8x1xf32>
    %29 = vector.shape_cast %28 : vector<1x8x1xf32> to vector<8x1xf32>
    %30 = vector.broadcast %29 : vector<8x1xf32> to vector<8x256xf32>
    %31 = arith.subf %27, %30 : vector<8x256xf32>
    %cst_21 = arith.constant 0.000000e+00 : f32
    %32 = vector.broadcast %cst_21 : f32 to vector<8x256xf32>
    %33 = arith.maximumf %31, %32 : vector<8x256xf32>
    %c0_22 = arith.constant 0 : index
    %34 = memref.load %arg5[%c0_22] : memref<1xf32, #tpu.memory_space<smem>>
    %35 = arith.subf %26, %33 : vector<8x256xf32>
    %36 = vector.broadcast %34 : f32 to vector<8x256xf32>
    %37 = arith.mulf %36, %35 : vector<8x256xf32>
    %38 = arith.subf %21, %37 : vector<8x256xf32>
    %c0_23 = arith.constant 0 : index
    %c0_24 = arith.constant 0 : index
    %c0_25 = arith.constant 0 : index
    %39 = vector.load %arg3[%c0_23, %c0_24, %c0_25] : memref<1x8x8xf32, #tpu.memory_space<vmem>>, vector<1x8x8xf32>
    %40 = vector.shape_cast %39 : vector<1x8x8xf32> to vector<8x8xf32>
    %41 = arith.addf %33, %38 : vector<8x256xf32>
    %cst_26 = arith.constant dense<0.000000e+00> : vector<8x256xf32>
    %42 = tpu.matmul %40, %41, %cst_26 {dimension_numbers = #tpu.dot_dimension_numbers<[1], [0], [0], [1], [0, 0, 1, 1], [], []>} : vector<8x8xf32>, vector<8x256xf32>, vector<8x256xf32> -> vector<8x256xf32>
    %43 = arith.addf %2, %42 : vector<8x256xf32>
    %44 = arith.subf %43, %38 : vector<8x256xf32>
    %c0_27 = arith.constant 0 : index
    %c0_28 = arith.constant 0 : index
    %c0_29 = arith.constant 0 : index
    %45 = vector.load %arg4[%c0_27, %c0_28, %c0_29] : memref<1x8x1xf32, #tpu.memory_space<vmem>>, vector<1x8x1xf32>
    %46 = vector.shape_cast %45 : vector<1x8x1xf32> to vector<8x1xf32>
    %47 = vector.broadcast %46 : vector<8x1xf32> to vector<8x256xf32>
    %48 = arith.subf %44, %47 : vector<8x256xf32>
    %cst_30 = arith.constant 0.000000e+00 : f32
    %49 = vector.broadcast %cst_30 : f32 to vector<8x256xf32>
    %50 = arith.maximumf %48, %49 : vector<8x256xf32>
    %cst_31 = arith.constant dense<0.000000e+00> : vector<256xf32>
    %51 = vector.multi_reduction <add>, %50, %cst_31 [0] : vector<8x256xf32> to vector<256xf32>
    %52 = vector.shape_cast %51 : vector<256xf32> to vector<1x256xf32>
    %cst_32 = arith.constant 9.99999997E-7 : f32
    %53 = vector.broadcast %cst_32 : f32 to vector<1x256xf32>
    %54 = arith.addf %52, %53 : vector<1x256xf32>
    %55 = tpu.reciprocal %54 {approx = true} : vector<1x256xf32> -> vector<1x256xf32>
    %56 = arith.mulf %54, %55 : vector<1x256xf32>
    %cst_33 = arith.constant 2.000000e+00 : f32
    %57 = vector.broadcast %cst_33 : f32 to vector<1x256xf32>
    %58 = arith.subf %57, %56 : vector<1x256xf32>
    %59 = arith.mulf %55, %58 : vector<1x256xf32>
    %60 = vector.broadcast %59 : vector<1x256xf32> to vector<8x256xf32>
    %61 = arith.mulf %50, %60 : vector<8x256xf32>
    %c0_34 = arith.constant 0 : index
    %c0_35 = arith.constant 0 : index
    %62 = vector.load %arg7[%c0_34, %c0_35] : memref<8x256xf32, #tpu.memory_space<vmem>>, vector<8x256xf32>
    tpu.vector_store %arg7[%c0_34, %c0_35], %61 {strides = array<i32>} : memref<8x256xf32, #tpu.memory_space<vmem>>, vector<8x256xf32>,
    %c0_36 = arith.constant 0 : index
    %c0_37 = arith.constant 0 : index
    %63 = vector.load %arg6[%c0_36, %c0_37] : memref<32x8xf32, #tpu.memory_space<vmem>>, vector<32x8xf32>
    %cst_38 = arith.constant dense<0.000000e+00> : vector<32x256xf32>
    %64 = tpu.matmul %63, %61, %cst_38 {dimension_numbers = #tpu.dot_dimension_numbers<[1], [0], [0], [1], [0, 0, 1, 1], [], []>} : vector<32x8xf32>, vector<8x256xf32>, vector<32x256xf32> -> vector<32x256xf32>
    %c0_39 = arith.constant 0 : index
    %c0_40 = arith.constant 0 : index
    %65 = vector.load %arg8[%c0_39, %c0_40] : memref<32x256xf32, #tpu.memory_space<vmem>>, vector<32x256xf32>
    tpu.vector_store %arg8[%c0_39, %c0_40], %64 {strides = array<i32>} : memref<32x256xf32, #tpu.memory_space<vmem>>, vector<32x256xf32>,
    return
  }
  func.func @transform_0(%arg0: i32) -> (i32, i32) {
    %c0_i32 = arith.constant 0 : i32
    %c0_i32_0 = arith.constant 0 : i32
    return %c0_i32, %arg0 : i32, i32
  }
  func.func @transform_1(%arg0: i32) -> (i32, i32) {
    %c0_i32 = arith.constant 0 : i32
    %c0_i32_0 = arith.constant 0 : i32
    %c0_i32_1 = arith.constant 0 : i32
    return %c0_i32, %c0_i32_0 : i32, i32
  }
  func.func @transform_2(%arg0: i32) -> (i32, i32, i32) {
    %c0_i32 = arith.constant 0 : i32
    %c0_i32_0 = arith.constant 0 : i32
    %c0_i32_1 = arith.constant 0 : i32
    %c0_i32_2 = arith.constant 0 : i32
    return %c0_i32, %c0_i32_0, %c0_i32_1 : i32, i32, i32
  }
  func.func @transform_3(%arg0: i32) -> (i32, i32, i32) {
    %c0_i32 = arith.constant 0 : i32
    %c0_i32_0 = arith.constant 0 : i32
    %c0_i32_1 = arith.constant 0 : i32
    %c0_i32_2 = arith.constant 0 : i32
    return %c0_i32, %c0_i32_0, %c0_i32_1 : i32, i32, i32
  }
  func.func @transform_4(%arg0: i32) -> i32 {
    %c0_i32 = arith.constant 0 : i32
    %c0_i32_0 = arith.constant 0 : i32
    return %c0_i32 : i32
  }
  func.func @transform_5(%arg0: i32) -> (i32, i32) {
    %c0_i32 = arith.constant 0 : i32
    %c0_i32_0 = arith.constant 0 : i32
    %c0_i32_1 = arith.constant 0 : i32
    return %c0_i32, %c0_i32_0 : i32, i32
  }
  func.func @transform_6(%arg0: i32) -> (i32, i32) {
    %c0_i32 = arith.constant 0 : i32
    %c0_i32_0 = arith.constant 0 : i32
    return %c0_i32, %arg0 : i32, i32
  }
  func.func @transform_7(%arg0: i32) -> (i32, i32) {
    %c0_i32 = arith.constant 0 : i32
    %c0_i32_0 = arith.constant 0 : i32
    return %c0_i32, %arg0 : i32, i32
  }
}

</mosaic_0001>

<bundles_post_ra>
// kernel: admmnet_forward.1
= control target key start
LH: loop header
LB: loop body
LE: loop exit
PB: predicated region body
PF: predicated region fallthrough
CT: control target
= control target key end

     0   :  { %s1238_s0 = inlined_call_operand.hbm [shape: f32[32,512], index: 0, kind: input, shape index: {}]   ;;  %s1239_s1 = inlined_call_operand.vmem [shape: f32[8,32], index: 1, kind: input, shape index: {}]   ;;  %s1240_s2 = inlined_call_operand.vmem [shape: f32[1,8,8], index: 2, kind: input, shape index: {}]   ;;  %s1241_s3 = inlined_call_operand.vmem [shape: f32[1,8,1], index: 3, kind: input, shape index: {}]   ;;  %s1242_s4 = inlined_call_operand.<no memory space> [shape: f32[1], index: 4, kind: input, shape index: {}]   ;;  %s1243_s5 = inlined_call_operand.vmem [shape: f32[32,8], index: 5, kind: input, shape index: {}]   ;;  %s1244_s6 = inlined_call_operand.hbm [shape: f32[8,512], index: 6, kind: output, shape index: {0}]   ;;  %s1245_s7 = inlined_call_operand.hbm [shape: f32[32,512], index: 7, kind: output, shape index: {1}]  }
   0x1   :  { %1247 = sst [smem:[#allocation12_spill]] %s1238_s0 }
   0x2   :  { %13 = sst [smem:[#allocation2]] %s1242_s4 }
   0x3   :  { %14 = vsyncpa [#allocation4], 0 }
   0x4   :  { %16 = vsyncpa [#allocation4 + $0x1], 0 }
   0x5   :  { %17 = vsyncpa [#allocation5], 0 }
   0x6   :  { %19 = vsyncpa [#allocation5 + $0x1], 0 }
   0x7   :  { %20 = vsyncpa [#allocation8], 0 }
   0x8   :  { %22 = vsyncpa [#allocation8 + $0x1], 0  ;;  %s1049_s26 = smov 0   ;;  %s1051_s27 = smov 0  }
   0x9   :  { %s1053_s28 = smov 0   ;;  %s1055_s29 = smov 0  }
   0xa LB: > { %s1070_s4 = sadd.s32 4294967295, %s996_s29   ;;  %s768_s30 = sadd.s32 4294967294, %s996_s29   ;;  %s996_s29 = sphi %s1055_s29, %s1258_s29   ;;  %s992_s28 = sphi %s1053_s28, %s1257_s28   ;;  %s988_s27 = sphi %s1051_s27, %s1256_s27   ;;  %s984_s26 = sphi %s1049_s26, %s1255_s26  }
   0xb   : > { %s1074_s8 = sadd.s32 1, %s996_s29   ;;  %s35_s9 = sadd.s32 1, %s992_s28 }
   0xc   : > { %s32_s10 = ssub.s32 %s996_s29, %s1074_s8  ;;  %p42_p0 = scmp.ne.s32.totalorder %s992_s28, %s988_s27 }
   0xd   : > { %p33_p1 = scmp.eq.s32.totalorder %s32_s10, 0  ;;  %p43_p2 = scmp.eq.s32.totalorder %s996_s29, 0 }
   0xe   : > { %p48_p3 = scmp.ne.s32.totalorder %s988_s27, %s984_s26  ;;  %p49_p4 = scmp.eq.s32.totalorder %s1070_s4, 0 }
   0xf   : > { %s1086_s11 = scalar_select %p33_p1, %s992_s28, %s35_s9  }
  0x10   : > { %p1088_p5 = por %p43_p2, %p42_p0  ;;  %p1092_p6 = por %p49_p4, %p48_p3 }
  0x11   : > { %p177_p7 = scmp.eq.s32.totalorder %s1070_s4, 1  ;;  %p183_p8 = scmp.eq.s32.totalorder %s768_s30, 1 }
  0x12   : > { %p770_p9 = scmp.ge.s32.totalorder %s996_s29, 2  ;;  %p821_p10 = scmp.lt.s32.totalorder %s996_s29, 2 }
  0x13   : > { %p1099_p11 = por %p177_p7, %p42_p0  ;;  %p1103_p12 = por %p183_p8, %p48_p3 }
  0x14   : > { %s244_s16 = sand.u32 1, %s992_s28   ;;  %s801_s17 = sshll.u32 %s996_s29, 4 }
  0x15   : > { %s771_s18 = sshll.u32 %s244_s16, 6  ;;  %s1252_s0 = sld [smem:[#allocation12_spill]] }
  0x16   : > { %s248_s23 = scalar_lea.vmem [#allocation3], %s771_s18  ;;  %p1114_p13 = pnand %p821_p10, %p1088_p5 }
  0x17   : > { %s256_s24 = sshll.u32 %s248_s23, 4  ;;  %p774_p0 = scmp.ge.s32.totalorder %s996_s29, 1  ;;  %s257_s24 = int_to_ptr.vmem [resolvable:$true] %s256_s24 }
  0x18   : > { %s245_s30 = scalar_lea.sflag [#allocation4], %s244_s16  ;;  %p872_p2 = pneg %p1114_p13 }
  0x1b   : > { %s253_s21 = scalar_lea.hbm %s1252_s0, %s801_s17  ;;  %s875_s19 = scalar_lea.hbm %s1252_s0, 128 }
  0x1c   : > { %s254_s22 = sshll.u32 %s253_s21, 4  ;;  %s255_s22 = int_to_ptr.hbm [resolvable:$true] %s254_s22 }
  0x1d   : > { %s868_s9 = sshra.s32 %s255_s22, 4  ;;  %s869_s9 = int_to_ptr.hbm [resolvable:$true] %s868_s9 }
  0x1e   : > { %s870_s10 = scalar_lea.hbm %s869_s9, 64  ;;  %p876_p5 = scmp.lt.s32.totalorder %s869_s9, %s1252_s0 }
  0x1f   : > { %p871_p1 = scmp.ne.s32.totalorder %s869_s9, %s870_s10  ;;  %p877_p7 = scmp.lt.s32.totalorder %s875_s19, %s870_s10 }
  0x21   : > { %p873_p3 = pnand %p872_p2, %p871_p1  ;;  %p878_p8 = por %p877_p7, %p876_p5 }
  0x23   : > { %p874_p4 = pneg %p873_p3 }
  0x25   : > { %p879_p10 = pnand %p878_p8, %p874_p4 }
  0x27   : > { %882 = shalt.err (!%p879_p10)
}
  0x28   : > { %s998_s16 = smov 512   ;;  %s999_s21 = smov 256  }
  0x29   : > { %s1000_s23 = smov 16   ;;  %p264_p1 = scmp.lt.s32.totalorder %s996_s29, 3 }
  0x2a   : > { %813 = dma.hbm_to_vmem [thread:$0]  (!%p1114_p13), %s255_s22, 1024, %s257_s24, %s245_s30, %s998_s16, %s999_s21, %s1000_s23  }
  0x2b   : > { %p265_p2 = pnand %p774_p0, %p264_p1 }
  0x2c   : > { %s1133_s17 = sand.u32 (!%p265_p2), 1, %s988_s27  }
  0x2d   : > { %268 = sbr.rel (%p265_p2) target bundleno = 683 (0x2ab), region = 44  ;;  %s1246_s9 = sshll.u32 (!%p265_p2), %s1133_s17, 6 }
  0x2e   : > { %s271_s10 = scalar_lea.sflag (!%p265_p2), [#allocation4], %s1133_s17  ;;  %s274_s18 = scalar_lea.vmem (!%p265_p2), [#allocation3], %s1246_s9 }
  0x32   : > { %971 = dma.done.wait (%p1092_p6), %s271_s10, 1024  }
  0x33   : > { %973 = vsyncadd (%p1092_p6), %s271_s10, 4294966272  ;;  %v1001_v0 = vmov 0.0   ;;  %v1002_v1 = vmov 0   ;;  %vm368_vm0 = vcmask 64512   ;;  %v320_v2 = vld [vmem:[%s274_s18 + $0x30] sm:$0xff]  ;;  %v1146_v3 = vld [vmem:[%s1240_s2] sm:$0xff] }
  0x34   : > { %387 = vmatpush.msra.mxu3 %v1001_v0  ;;  %863 = vset.pattern.permute.xlu0 %v1002_v1  ;;  %v318_v4 = vld [vmem:[%s274_s18 + $0x20] sm:$0xff]  ;;  %v316_v5 = vld [vmem:[%s274_s18 + $0x10] sm:$0xff]  ;;  %vm323_vm1 = vcmask 261120   ;;  %v321_v9 = vld [vmem:[%s274_s18 + $0x38] sm:$0xff]  ;;  %s404_s12 = sld [smem:[#allocation2]]  ;;  %s776_s20 = sshll.u32 %s1133_s17, 4 }
  0x35   : > { %339 = vmatpush.msra.mxu0 %v320_v2  ;;  %780 = vmatmul.msk.f32.vlgmr.msra.gmra.mxu3 %vm368_vm0, %v1146_v3  ;;  %v394_v6 = vld [vmem:[%s1241_s3] sm:$0xff]  ;;  %v319_v10 = vld [vmem:[%s274_s18 + $0x28] sm:$0xff]  ;;  %v317_v11 = vld [vmem:[%s274_s18 + $0x18] sm:$0xff]  ;;  %s303_s16 = scalar_lea.vmem [#allocation6], %s776_s20  ;;  %s802_s30 = sshll.u32 %s1070_s4, 4 }
  0x36   : > { %v314_v7 = vld [vmem:[%s274_s18] sm:$0xff]  ;;  %397 = vperm.xlu0 %863, %v394_v6   ;;  %v315_v12 = vld [vmem:[%s274_s18 + $0x8] sm:$0xff]  ;;  %s643_s20 = scalar_lea.hbm %s1244_s6, %s802_s30  ;;  %s645_s21 = sshll.u32 %s303_s16, 4  ;;  %s646_s21 = int_to_ptr.vmem [resolvable:$true] %s645_s21 }
  0x37   : > { %340 = vmatpush.msra.mxu0 %v318_v4  ;;  %v322_v8 = vld [vmem:[%s1239_s1] sm:$0xff]  ;;  %s647_s23 = sshll.u32 %s643_s20, 4  ;;  %s627_s10 = scalar_lea.sflag [#allocation5], %s1133_s17  ;;  %s648_s23 = int_to_ptr.hbm [resolvable:$true] %s647_s23 }
  0x38   : > { %s912_s18 = sshra.s32 %s648_s23, 4  ;;  %s918_s25 = scalar_lea.hbm %s1244_s6, 32  ;;  %s913_s18 = int_to_ptr.hbm [resolvable:$true] %s912_s18 }
  0x39   : > { %341 = vmatpush.msra.mxu0 %v316_v5  ;;  %s914_s22 = scalar_lea.hbm %s913_s18, 16  ;;  %p919_p3 = scmp.lt.s32.totalorder %s913_s18, %s1244_s6 }
  0x3a   : > { %v407_v19 = vstv %s404_s12  ;;  %p915_p6 = scmp.ne.s32.totalorder %s913_s18, %s914_s22  ;;  %p920_p4 = scmp.lt.s32.totalorder %s918_s25, %s914_s22 }
  0x3b   : > { %342 = vmatpush.msra.mxu0 %v314_v7 }
  0x3c   : > { %778 = vmatmul.msk.f32.vlgmr.msra.gmra.mxu0 %vm323_vm1, %v322_v8  ;;  %p916_p13 = pnand %p915_p6, %p1099_p11  ;;  %p921_p5 = por %p920_p4, %p919_p3 }
  0x3d   : > { %359 = vmatpush.msrb.mxu0 %v321_v9 }
  0x3e   : > { %p917_p0 = pneg %p916_p13 }
  0x3f   : > { %360 = vmatpush.msrb.mxu0 %v319_v10 }
  0x40   : > { %p922_p7 = pnand %p921_p5, %p917_p0 }
  0x41   : > { %361 = vmatpush.msrb.mxu0 %v317_v11 }
  0x43   : > { %362 = vmatpush.msrb.mxu0 %v315_v12 }
  0x44   : > { %779 = vmatmul.msk.f32.vlgmr.msrb.gmra.mxu0 %vm323_vm1, %v322_v8 }
  0xa8   : > { %v398_v15 = vpop.permute.xlu0 %397 }
  0xb8   : > { %v389_v13 = vpop.f32.mrf.mxu3 }
  0xb9   : > { %v344_v14 = vpop.f32.mrf.mxu0 }
  0xba   : > { %v392_v16 = vadd.f32 %v389_v13, %v344_v14 }
  0xbc   : > { %v400_v17 = vsub.f32 %v392_v16, %v398_v15 }
  0xbe   : > { %v402_v18 = vmax.f32 %v400_v17, 0.0 }
  0xc0   : > { %v405_v20 = vsub.f32 %v392_v16, %v402_v18 }
  0xc1   : > { %v364_v21 = vpop.f32.mrf.mxu0 }
  0xc2   : > { %v393_v22 = vadd.f32 %v389_v13, %v364_v21  ;;  %v408_v23 = vmul.f32 %v407_v19, %v405_v20  ;;  %v544_v20 = vld [vmem:[%s1243_s5] sm:$0xff] }
  0xc4   : > { %v401_v24 = vsub.f32 %v393_v22, %v398_v15  ;;  %v410_v25 = vsub.f32 0.0, %v408_v23  ;;  %v547_v23 = vld [vmem:[%s1243_s5 + $0x18] sm:$0xff] }
  0xc6   : > { %v403_v26 = vmax.f32 %v401_v24, 0.0  ;;  %v412_v27 = vadd.f32 %v410_v25, %v402_v18 }
  0xc8   : > { %v406_v28 = vsub.f32 %v393_v22, %v403_v26  ;;  %429 = vmatpush.msrb.mxu3 %v412_v27  ;;  %v546_v22 = vld [vmem:[%s1243_s5 + $0x10] sm:$0xff] }
  0xc9   : > { %781 = vmatmul.msk.f32.vlgmr.msrb.gmra.mxu3 %vm368_vm0, %v1146_v3 }
  0xca   : > { %v409_v29 = vmul.f32 %v407_v19, %v406_v28 }
  0xcc   : > { %v411_v30 = vsub.f32 0.0, %v409_v29 }
  0xce   : > { %v413_v31 = vadd.f32 %v411_v30, %v403_v26 }
  0xd0   : > { %449 = vmatpush.msra.mxu3 %v413_v31 }
  0xd1   : > { %782 = vmatmul.msk.f32.vlgmr.msra.gmra.mxu3 %vm368_vm0, %v1146_v3 }
 0x14c   : > { %v431_v32 = vpop.f32.mrf.mxu3 }
 0x14d   : > { %v454_v33 = vadd.f32 %v431_v32, %v344_v14 }
 0x14f   : > { %v456_v34 = vsub.f32 %v454_v33, %v410_v25 }
 0x151   : > { %v458_v35 = vsub.f32 %v456_v34, %v398_v15 }
 0x153   : > { %v460_v36 = vmax.f32 %v458_v35, 0.0 }
 0x154   : > { %v451_v37 = vpop.f32.mrf.mxu3 }
 0x155   : > { %v462_v38 = vsub.f32 %v454_v33, %v460_v36  ;;  %v455_v39 = vadd.f32 %v451_v37, %v364_v21 }
 0x157   : > { %v464_v40 = vmul.f32 %v462_v38, %v407_v19  ;;  %v457_v41 = vsub.f32 %v455_v39, %v411_v30 }
 0x159   : > { %v466_v42 = vsub.f32 %v410_v25, %v464_v40  ;;  %v459_v43 = vsub.f32 %v457_v41, %v398_v15 }
 0x15b   : > { %v468_v44 = vadd.f32 %v466_v42, %v460_v36  ;;  %v461_v45 = vmax.f32 %v459_v43, 0.0 }
 0x15d   : > { %v463_v46 = vsub.f32 %v455_v39, %v461_v45  ;;  %485 = vmatpush.msrb.mxu3 %v468_v44 }
 0x15e   : > { %783 = vmatmul.msk.f32.vlgmr.msrb.gmra.mxu3 %vm368_vm0, %v1146_v3 }
 0x15f   : > { %v465_v47 = vmul.f32 %v463_v46, %v407_v19 }
 0x161   : > { %v467_v48 = vsub.f32 %v411_v30, %v465_v47 }
 0x163   : > { %v469_v49 = vadd.f32 %v467_v48, %v461_v45 }
 0x165   : > { %505 = vmatpush.msra.mxu0 %v469_v49 }
 0x166   : > { %784 = vmatmul.msk.f32.vlgmr.msra.gmra.mxu0 %vm368_vm0, %v1146_v3 }
 0x1e1   : > { %v487_v50 = vpop.f32.mrf.mxu3 }
 0x1e2   : > { %v510_v51 = vadd.f32 %v487_v50, %v344_v14 }
 0x1e3   : > { %v507_v52 = vpop.f32.mrf.mxu0 }
 0x1e4   : > { %v512_v53 = vsub.f32 %v510_v51, %v466_v42  ;;  %v511_v54 = vadd.f32 %v507_v52, %v364_v21  ;;  %v545_v21 = vld [vmem:[%s1243_s5 + $0x8] sm:$0xff] }
 0x1e6   : > { %v514_v55 = vsub.f32 %v512_v53, %v398_v15  ;;  %v513_v56 = vsub.f32 %v511_v54, %v467_v48 }
 0x1e8   : > { %v516_v57 = vmax.f32 %v514_v55, 0.0  ;;  %v515_v58 = vsub.f32 %v513_v56, %v398_v15 }
 0x1ea   : > { %v518_v59 = vrot.slane %v516_v57, 4  ;;  %v517_v60 = vmax.f32 %v515_v58, 0.0 }
 0x1ec   : > { %v519_v61 = vadd.f32 %v518_v59, %v516_v57  ;;  %v524_v62 = vrot.slane %v517_v60, 4 }
 0x1ee   : > { %v520_v63 = vrot.slane %v519_v61, 2  ;;  %v525_v0 = vadd.f32 %v524_v62, %v517_v60 }
 0x1f0   : > { %v526_v1 = vrot.slane %v525_v0, 2  ;;  %v521_v2 = vadd.f32 %v520_v63, %v519_v61 }
 0x1f2   : > { %v522_v4 = vrot.slane %v521_v2, 1  ;;  %v527_v3 = vadd.f32 %v526_v1, %v525_v0 }
 0x1f4   : > { %v523_v5 = vadd.f32 %v522_v4, %v521_v2  ;;  %v528_v6 = vrot.slane %v527_v3, 1 }
 0x1f6   : > { %v530_v7 = vadd.f32 1e-06, %v523_v5  ;;  %v529_v8 = vadd.f32 %v528_v6, %v527_v3 }
 0x1f8   : > { %864 = vrcp.f32 %v530_v7  ;;  %v531_v9 = vadd.f32 1e-06, %v529_v8 }
 0x1fa   : > { %866 = vrcp.f32 %v531_v9 }
 0x1fe   : > { %v865_v10 = vpop.eup %864 }
 0x1ff   : > { %v534_v11 = vmul.f32 %v865_v10, %v530_v7 }
 0x200   : > { %v867_v12 = vpop.eup %866 }
 0x201   : > { %v536_v13 = vsub.f32 2.0, %v534_v11  ;;  %v535_v14 = vmul.f32 %v867_v12, %v531_v9 }
 0x203   : > { %v538_v15 = vmul.f32 %v865_v10, %v536_v13  ;;  %v537_v16 = vsub.f32 2.0, %v535_v14 }
 0x205   : > { %v540_v17 = vmul.f32 %v538_v15, %v516_v57  ;;  %v539_v18 = vmul.f32 %v867_v12, %v537_v16 }
 0x207   : > { %542 = vst [vmem:[%s303_s16] sm:$0xff] %v540_v17  ;;  %575 = vmatpush.msra.mxu1 %v540_v17  ;;  %v541_v19 = vmul.f32 %v539_v18, %v517_v60 }
 0x208   : > { %785 = vmatmul.msk.f32.vlgmr.msra.gmra.mxu1 %vm368_vm0, %v544_v20 }
 0x209   : > { %543 = vst [vmem:[%s303_s16 + $0x8] sm:$0xff] %v541_v19  ;;  %604 = vmatpush.msra.mxu2 %v541_v19 }
 0x20a   : > { %789 = vmatmul.msk.f32.vlgmr.msra.gmra.mxu2 %vm368_vm0, %v544_v20 }
 0x210   : > { %786 = vmatmul.msk.f32.gmra.mxu1 %vm368_vm0, %v545_v21 }
 0x212   : > { %790 = vmatmul.msk.f32.gmra.mxu2 %vm368_vm0, %v545_v21 }
 0x218   : > { %787 = vmatmul.msk.f32.gmra.mxu1 %vm368_vm0, %v546_v22 }
 0x21a   : > { %791 = vmatmul.msk.f32.gmra.mxu2 %vm368_vm0, %v546_v22 }
 0x220   : > { %788 = vmatmul.msk.f32.gmra.mxu1 %vm368_vm0, %v547_v23 }
 0x222   : > { %792 = vmatmul.msk.f32.gmra.mxu2 %vm368_vm0, %v547_v23 }
 0x223   : > { %925 = shalt.err (!%p922_p7)
}
 0x224   : > { %806 = dma.vmem_to_hbm [thread:$0]  (%p1099_p11), %s646_s21, 256, %s648_s23, %s627_s10  }
 0x225   : > { %s1254_s16 = sshll.u32 %s1133_s17, 6  ;;  %s658_s12 = scalar_lea.hbm %s1245_s7, %s802_s30 }
 0x226   : > { %s310_s19 = scalar_lea.vmem [#allocation7], %s1254_s16  ;;  %s661_s21 = sshll.u32 %s658_s12, 4  ;;  %s662_s21 = int_to_ptr.hbm [resolvable:$true] %s661_s21 }
 0x227   : > { %s659_s20 = sshll.u32 %s310_s19, 4  ;;  %s632_s23 = scalar_lea.sflag [#allocation8], %s1133_s17  ;;  %s660_s20 = int_to_ptr.vmem [resolvable:$true] %s659_s20 }
 0x228   : > { %s940_s10 = sshra.s32 %s662_s21, 4  ;;  %s946_s22 = scalar_lea.hbm %s1245_s7, 128  ;;  %s941_s10 = int_to_ptr.hbm [resolvable:$true] %s940_s10 }
 0x229   : > { %s942_s18 = scalar_lea.hbm %s941_s10, 64  ;;  %p947_p2 = scmp.lt.s32.totalorder %s941_s10, %s1245_s7 }
 0x22a   : > { %p943_p8 = scmp.ne.s32.totalorder %s941_s10, %s942_s18  ;;  %p948_p6 = scmp.lt.s32.totalorder %s946_s22, %s942_s18 }
 0x22c   : > { %p944_p10 = pnand %p943_p8, %p1099_p11  ;;  %p949_p13 = por %p948_p6, %p947_p2 }
 0x22e   : > { %p945_p1 = pneg %p944_p10 }
 0x230   : > { %p950_p0 = pnand %p949_p13, %p945_p1 }
 0x285   : > { %v577_v24 = vpop.f32.mrf.mxu1 }
 0x286   : > { %618 = vst [vmem:[%s310_s19] sm:$0xff] %v577_v24 }
 0x28d   : > { %v606_v25 = vpop.f32.mrf.mxu2  ;;  %v580_v26 = vpop.f32.mrf.mxu1 }
 0x28e   : > { %619 = vst [vmem:[%s310_s19 + $0x8] sm:$0xff] %v606_v25 }
 0x28f   : > { %620 = vst [vmem:[%s310_s19 + $0x10] sm:$0xff] %v580_v26 }
 0x295   : > { %v609_v27 = vpop.f32.mrf.mxu2  ;;  %v583_v28 = vpop.f32.mrf.mxu1 }
 0x296   : > { %621 = vst [vmem:[%s310_s19 + $0x18] sm:$0xff] %v609_v27 }
 0x297   : > { %622 = vst [vmem:[%s310_s19 + $0x20] sm:$0xff] %v583_v28 }
 0x29d   : > { %v612_v29 = vpop.f32.mrf.mxu2  ;;  %v586_v30 = vpop.f32.mrf.mxu1 }
 0x29e   : > { %623 = vst [vmem:[%s310_s19 + $0x28] sm:$0xff] %v612_v29 }
 0x29f   : > { %624 = vst [vmem:[%s310_s19 + $0x30] sm:$0xff] %v586_v30 }
 0x2a5   : > { %v615_v31 = vpop.f32.mrf.mxu2 }
 0x2a6   : > { %625 = vst [vmem:[%s310_s19 + $0x38] sm:$0xff] %v615_v31 }
 0x2a7   : > { %953 = shalt.err (!%p950_p0)
}
 0x2a8   : > { %s1003_s17 = smov 256   ;;  %s1004_s25 = smov 512  }
 0x2a9   : > { %s1005_s16 = smov 16  }
 0x2aa   : > { %807 = dma.vmem_to_hbm [thread:$0]  (%p1099_p11), %s660_s20, 1024, %s662_s21, %s632_s23, %s1003_s17, %s1004_s25, %s1005_s16  }
 0x2ab PF: > { %s676_s19 = sand.u32 1, %s984_s26   ;;  %p815_p3 = pnand %p770_p9, %p1103_p12 }
 0x2ac   : > { %s677_s0 = scalar_lea.sflag [#allocation5], %s676_s19 }
 0x2ad   : > { %p816_p4 = pneg %p815_p3 }
 0x2af   : > { %975 = dma.done.wait (%p816_p4), %s677_s0, 256  }
 0x2b0   : > { %977 = vsyncadd (%p816_p4), %s677_s0, 4294967040  ;;  %s687_s9 = scalar_lea.sflag [#allocation8], %s676_s19 }
 0x2b1   : > { %979 = dma.done.wait (%p816_p4), %s687_s9, 1024  }
 0x2b2   : > { %981 = vsyncadd (%p816_p4), %s687_s9, 4294966272  ;;  %p25_p11 = scmp.ge.s32.totalorder %s1074_s8, 4   ;;  %s1255_s26 = smov %s988_s27 }
 0x2b3   : > { %s1256_s27 = smov %s992_s28  ;;  %s1257_s28 = smov %s1086_s11 }
 0x2b4   : > { %s1258_s29 = smov %s1074_s8  ;;  %27 = sbr.rel (!%p25_p11) target bundleno = 10 (0xa), region = 106 }
 0x2b9   :  { %693 = vsyncpa [#allocation4], 1 }
 0x2ba   :  { %695 = vsyncpa [#allocation4 + $0x1], 1 }
 0x2bb   :  { %696 = vsyncpa [#allocation5], 1 }
 0x2bc   :  { %698 = vsyncpa [#allocation5 + $0x1], 1 }
 0x2bd   :  { %699 = vsyncpa [#allocation8], 1 }
 0x2be   :  { %701 = vsyncpa [#allocation8 + $0x1], 1 }

</bundles_post_ra>
